<compile_context>
chip_gen: v7x
topology: tpu7x:2x2x1
jax: 0.10.0
libtpu: 0.0.40
codegen_flags: <defaults>
</compile_context>

<pallas_src>
import functools
import numpy as np

import jax
import jax.numpy as jnp
from jax.experimental import pallas as pl
from jax.experimental.pallas import tpu as pltpu


# ---------------------------------------------------------------------------
# trace-time helpers (numpy constants)
# ---------------------------------------------------------------------------
def _bilinear_weight_matrix(out_size, in_size):
    """Row-stochastic (out_size, in_size) matrix matching
    F.interpolate(mode='bilinear', align_corners=False) along one axis."""
    i = np.arange(out_size, dtype=np.float64)
    src = (i + 0.5) * (in_size / out_size) - 0.5
    src = np.maximum(src, 0.0)
    i0 = np.minimum(np.floor(src).astype(np.int64), in_size - 1)
    lam = src - i0
    i1 = np.minimum(i0 + 1, in_size - 1)
    W = np.zeros((out_size, in_size), dtype=np.float32)
    W[np.arange(out_size), i0] += (1.0 - lam).astype(np.float32)
    W[np.arange(out_size), i1] += lam.astype(np.float32)
    return jnp.asarray(W)


def _selection_matrices(n_out, rep, n_lat):
    """0/1 matrices S0, S1 of shape (n_out, n_lat):
       S0[i, r] = 1  iff  r == i // rep
       S1[i, r] = 1  iff  r == i // rep + 1
    Used to expand the Perlin gradient lattice to pixel resolution via matmul,
    reproducing torch.repeat_interleave + the four corner slicings."""
    idx = np.arange(n_out) // rep
    s0 = np.zeros((n_out, n_lat), dtype=np.float32)
    s1 = np.zeros((n_out, n_lat), dtype=np.float32)
    s0[np.arange(n_out), idx] = 1.0
    s1[np.arange(n_out), idx + 1] = 1.0
    return s0, s1


def _frac_positions(res, size):
    # torch: frac(linspace(0, res, size))
    p = jnp.linspace(0.0, float(res), size, dtype=jnp.float32)
    return p - jnp.floor(p)


# ---------------------------------------------------------------------------
# Kernel A: all Perlin octaves + bilinear upsample + alpha scale, fused.
#   inputs per octave: lattice (2, ry+1, rx+1), row-sel (2, Hp, ry+1),
#                      col-sel^T (2, rx+1, Wp), pos_y (Hp, 1), pos_x (1, Wp)
#   trailing inputs:   Wy (H, Hs), Wx^T (Ws, W);  alpha is an SMEM scalar.
#   output:            alpha-scaled full-resolution noise plane (H, W) f32.
# ---------------------------------------------------------------------------
def _make_fbm_noise_kernel(octave_meta, hermite):
    num_octaves = len(octave_meta)

    if hermite == "cubic":
        def herm(t):
            return 3.0 * t * t - 2.0 * t * t * t
    elif hermite == "quintic":
        def herm(t):
            return ((6.0 * t - 15.0) * t + 10.0) * t * t * t
    else:
        raise ValueError(f"unknown hermite curve: {hermite}")

    def kernel(alpha_ref, *refs):
        out_ref = refs[-1]
        wy_ref = refs[-3]      # (H, Hs)
        wxt_ref = refs[-2]     # (Ws, W)
        dot = functools.partial(jnp.dot, preferred_element_type=jnp.float32)

        acc = None
        for o in range(num_octaves):
            lat_ref, rsel_ref, cselt_ref, py_ref, px_ref = refs[5 * o: 5 * o + 5]
            amp, pad_y, pad_x = octave_meta[o]

            gy = lat_ref[0]           # cos(angles), paired with the y distance
            gx = lat_ref[1]           # sin(angles), paired with the x distance
            r0 = rsel_ref[0]          # (Hp, ry+1) selects row  i//dy
            r1 = rsel_ref[1]          # (Hp, ry+1) selects row  i//dy + 1
            c0 = cselt_ref[0]         # (rx+1, Wp) selects col  j//dx
            c1 = cselt_ref[1]         # (rx+1, Wp) selects col  j//dx + 1
            py = py_ref[...]          # (Hp, 1) fractional y positions
            px = px_ref[...]          # (1, Wp) fractional x positions

            # lattice expanded along columns: (ry+1, Wp)  (tiny matmuls, MXU)
            gy_c0, gy_c1 = dot(gy, c0), dot(gy, c1)
            gx_c0, gx_c1 = dot(gx, c0), dot(gx, c1)

            # corner dot products (distance . gradient), each (Hp, Wp)
            n00 = py * dot(r0, gy_c0) + px * dot(r0, gx_c0)
            n10 = (py - 1.0) * dot(r1, gy_c0) + px * dot(r1, gx_c0)
            n01 = py * dot(r0, gy_c1) + (px - 1.0) * dot(r0, gx_c1)
            n11 = (py - 1.0) * dot(r1, gy_c1) + (px - 1.0) * dot(r1, gx_c1)

            hy = herm(py)             # (Hp, 1)
            hx = herm(px)             # (1, Wp)
            # torch.lerp(a, b, w) = a + w * (b - a)
            n0 = n00 + (n10 - n00) * hy
            n1 = n01 + (n11 - n01) * hy
            n = n0 + (n1 - n0) * hx

            # min/max normalization over the padded (pre-crop) array, as in the reference
            mn = jnp.min(n, keepdims=True)
            mx = jnp.max(n, keepdims=True)
            n = (n - mn) * pl.reciprocal(mx - mn, approx=True)
            n = (n * 2.0 - 1.0) * amp
            if pad_y or pad_x:
                n = n[pad_y:, pad_x:]     # crop to (Hs, Ws)

            acc = n if acc is None else acc + n

        # bilinear upsample (align_corners=False) as two MXU matmuls, done ONCE,
        # and pre-scale by the random alpha so the streaming kernel is add+clamp only.
        up = jnp.dot(wy_ref[...], acc, preferred_element_type=jnp.float32)    # (H, Ws)
        up = jnp.dot(up, wxt_ref[...], preferred_element_type=jnp.float32)    # (H, W)
        out_ref[...] = up * alpha_ref[0]

    return kernel


def fbm_noise_plane(image_hw, small_hw, keys, alpha,
                    amplitude, resolution, persistence, lacunarity,
                    num_octaves, hermite):
    """Build the alpha-scaled, full-resolution fBm noise plane (H, W) float32."""
    H, W = int(image_hw[0]), int(image_hw[1])
    Hs, Ws = int(small_hw[0]), int(small_hw[1])

    inputs = [jnp.asarray(alpha, jnp.float32).reshape(1)]
    in_specs = [pl.BlockSpec(memory_space=pltpu.MemorySpace.SMEM)]   # alpha scalar
    octave_meta = []

    for octave in range(num_octaves):
        amp = float(amplitude) * float(persistence) ** octave
        ry = int(resolution[0] * lacunarity ** octave)
        rx = int(resolution[1] * lacunarity ** octave)
        pad_y = (ry - Hs % ry) % ry
        pad_x = (rx - Ws % rx) % rx
        Hp, Wp = Hs + pad_y, Ws + pad_x
        dy, dx = Hp // ry, Wp // rx

        # random gradient lattice angles (only the tiny lattice is traced / DMA'd)
        angles = 2.0 * np.pi * jax.random.uniform(
            keys[octave], (ry + 1, rx + 1), dtype=jnp.float32)
        lat = jnp.stack([jnp.cos(angles), jnp.sin(angles)], axis=0)   # (2, ry+1, rx+1)

        s_y0, s_y1 = _selection_matrices(Hp, dy, ry + 1)              # (Hp, ry+1)
        s_x0, s_x1 = _selection_matrices(Wp, dx, rx + 1)              # (Wp, rx+1)
        rsel = jnp.asarray(np.stack([s_y0, s_y1], axis=0))            # (2, Hp, ry+1)
        cselt = jnp.asarray(np.stack([s_x0.T, s_x1.T], axis=0))       # (2, rx+1, Wp)

        py = _frac_positions(ry, Hp).reshape(Hp, 1)
        px = _frac_positions(rx, Wp).reshape(1, Wp)

        for arr in (lat, rsel, cselt, py, px):
            inputs.append(arr)
            in_specs.append(
                pl.BlockSpec(arr.shape, lambda i, _nd=arr.ndim: (0,) * _nd))
        octave_meta.append((amp, pad_y, pad_x))

    wy = _bilinear_weight_matrix(H, Hs)          # (H, Hs)
    wxt = _bilinear_weight_matrix(W, Ws).T       # (Ws, W)
    for arr in (wy, wxt):
        inputs.append(arr)
        in_specs.append(pl.BlockSpec(arr.shape, lambda i: (0, 0)))

    kernel = _make_fbm_noise_kernel(tuple(octave_meta), hermite)
    return pl.pallas_call(
        kernel,
        out_shape=jax.ShapeDtypeStruct((H, W), jnp.float32),
        grid=(1,),
        in_specs=in_specs,
        out_specs=pl.BlockSpec((H, W), lambda i: (0, 0)),
        compiler_params=pltpu.CompilerParams(
            dimension_semantics=("arbitrary",)),
    )(*inputs)


# ---------------------------------------------------------------------------
# Kernel B: streaming  out = clip(image + noise, 0, 1)  over lane-dense tiles.
# ---------------------------------------------------------------------------
def _add_clamp_kernel(up_ref, img_ref, out_ref):
    out_ref[...] = jnp.clip(img_ref[...] + up_ref[...], 0.0, 1.0).astype(out_ref.dtype)


def _pick_lane_tile(hw, target=32768):
    """Largest divisor of hw that is a multiple of 128 and <= target
    (falls back to the full extent if hw is not 128-aligned)."""
    if hw % 128 != 0:
        return hw
    units = hw // 128
    best = 1
    d = 1
    while d * d <= units:
        if units % d == 0:
            for cand in (d, units // d):
                if cand * 128 <= target and cand > best:
                    best = cand
        d += 1
    return best * 128


def add_clamp(image_nchw, noise_plane):
    N, C, H, W = image_nchw.shape
    NC, HW = N * C, H * W
    img = image_nchw.reshape(NC, HW)          # lane-dense flattening (free reshape)
    up = noise_plane.reshape(1, HW)

    TB = 8 if NC % 8 == 0 else NC             # sublane block (8-aligned or full)
    TILE = _pick_lane_tile(HW)                # lane-dense tile (multiple of 128)
    grid = (NC // TB, HW // TILE)

    out = pl.pallas_call(
        _add_clamp_kernel,
        out_shape=jax.ShapeDtypeStruct((NC, HW), image_nchw.dtype),
        grid=grid,
        in_specs=[
            pl.BlockSpec((1, TILE), lambda i, j: (0, j)),    # noise: invariant over i
            pl.BlockSpec((TB, TILE), lambda i, j: (i, j)),   # image block
        ],
        out_specs=pl.BlockSpec((TB, TILE), lambda i, j: (i, j)),
        input_output_aliases={1: 0},                         # reuse the image buffer
        compiler_params=pltpu.CompilerParams(
            dimension_semantics=("parallel", "parallel")),   # v7x: shard across 2 TCs
    )(up, img)
    return out.reshape(N, C, H, W)


# ---------------------------------------------------------------------------
# Module wrapper
# ---------------------------------------------------------------------------
class FastFractalBrownianMotionPallas:
    """Pallas TPU implementation of FastFractalBrownianMotion.forward.
    Returns the augmented image array (the reference wraps it in a dict)."""

    def __init__(self, amplitude, resolution, persistence, lacunarity, num_octaves,
                 downscale_factor, hermite="cubic"):
        self.amplitude = float(amplitude)
        self.resolution = (int(resolution[0]), int(resolution[1]))
        self.persistence = persistence
        self.lacunarity = lacunarity
        self.num_octaves = int(num_octaves)
        self.downscale_factor = int(downscale_factor)
        self.hermite = hermite
        self._forward_jit = jax.jit(self._forward)

    def _forward(self, image, key):
        H, W = image.shape[-2], image.shape[-1]
        Hs, Ws = H // self.downscale_factor, W // self.downscale_factor
        keys = jax.random.split(key, self.num_octaves + 1)
        alpha = jax.random.uniform(keys[-1], (), dtype=jnp.float32)   # torch.rand(())
        noise = fbm_noise_plane(
            (H, W), (Hs, Ws), keys, alpha,
            self.amplitude, self.resolution, self.persistence, self.lacunarity,
            self.num_octaves, self.hermite)
        return add_clamp(image, noise)

    def __call__(self, image, key):
        return self._forward_jit(image, key)


if __name__ == "__main__":
    key = jax.random.PRNGKey(0)
    k_img, k_fbm = jax.random.split(key)

    # batch=2, channels=4, spatial=16 (NCHW), values already in [0, 1]
    image = jax.random.uniform(k_img, (2, 4, 16, 16), dtype=jnp.float32)

    fbm = FastFractalBrownianMotionPallas(
        amplitude=0.1, resolution=(2, 2), persistence=0.5, lacunarity=2,
        num_octaves=2, downscale_factor=2, hermite="cubic")

    out = fbm(image, k_fbm)
    jax.block_until_ready(out)

    assert out.shape == image.shape and out.dtype == image.dtype
    assert bool(jnp.all((out >= 0.0) & (out <= 1.0)))
    print("KERNEL_OK")
</pallas_src>

<mosaic_0001>
module attributes {stable_mosaic.version = 11 : i64} {
  func.func @_add_clamp_kernel(%arg0: i32, %arg1: i32, %arg2: memref<1x256xf32, #tpu.memory_space<vmem>>, %arg3: memref<8x256xf32, #tpu.memory_space<vmem>>, %arg4: memref<8x256xf32, #tpu.memory_space<vmem>>) attributes {dimension_semantics = [#tpu.dimension_semantics<parallel>, #tpu.dimension_semantics<parallel>], iteration_bounds = array<i64: 1, 1>, scalar_prefetch = 0 : i64, scratch_operands = 0 : i64, tpu.core_type = #tpu.core_type<tc>, window_params = [{transform_indices = @transform_0, window_bounds = array<i64: 1, 256>}, {transform_indices = @transform_1, window_bounds = array<i64: 8, 256>}, {transform_indices = @transform_2, window_bounds = array<i64: 8, 256>}]} {
    %c0 = arith.constant 0 : index
    %c0_0 = arith.constant 0 : index
    %0 = vector.load %arg3[%c0, %c0_0] : memref<8x256xf32, #tpu.memory_space<vmem>>, vector<8x256xf32>
    %c0_1 = arith.constant 0 : index
    %c0_2 = arith.constant 0 : index
    %1 = vector.load %arg2[%c0_1, %c0_2] : memref<1x256xf32, #tpu.memory_space<vmem>>, vector<1x256xf32>
    %2 = vector.broadcast %1 : vector<1x256xf32> to vector<8x256xf32>
    %3 = arith.addf %0, %2 : vector<8x256xf32>
    %cst = arith.constant 0.000000e+00 : f32
    %cst_3 = arith.constant 1.000000e+00 : f32
    %4 = vector.broadcast %cst : f32 to vector<8x256xf32>
    %5 = arith.maximumf %4, %3 : vector<8x256xf32>
    %6 = vector.broadcast %cst_3 : f32 to vector<8x256xf32>
    %7 = arith.minimumf %6, %5 : vector<8x256xf32>
    %c0_4 = arith.constant 0 : index
    %c0_5 = arith.constant 0 : index
    %8 = vector.load %arg4[%c0_4, %c0_5] : memref<8x256xf32, #tpu.memory_space<vmem>>, vector<8x256xf32>
    tpu.vector_store %arg4[%c0_4, %c0_5], %7 {strides = array<i32>} : memref<8x256xf32, #tpu.memory_space<vmem>>, vector<8x256xf32>,
    return
  }
  func.func @transform_0(%arg0: i32, %arg1: i32) -> (i32, i32) {
    %c0_i32 = arith.constant 0 : i32
    %c0_i32_0 = arith.constant 0 : i32
    return %c0_i32, %arg1 : i32, i32
  }
  func.func @transform_1(%arg0: i32, %arg1: i32) -> (i32, i32) {
    %c0_i32 = arith.constant 0 : i32
    return %arg0, %arg1 : i32, i32
  }
  func.func @transform_2(%arg0: i32, %arg1: i32) -> (i32, i32) {
    %c0_i32 = arith.constant 0 : i32
    return %arg0, %arg1 : i32, i32
  }
}

module attributes {stable_mosaic.version = 11 : i64} {
  func.func @kernel(%arg0: i32, %arg1: memref<1xf32, #tpu.memory_space<smem>>, %arg2: memref<2x3x3xf32, #tpu.memory_space<vmem>>, %arg3: memref<2x8x3xf32, #tpu.memory_space<vmem>>, %arg4: memref<2x3x8xf32, #tpu.memory_space<vmem>>, %arg5: memref<8x1xf32, #tpu.memory_space<vmem>>, %arg6: memref<1x8xf32, #tpu.memory_space<vmem>>, %arg7: memref<2x5x5xf32, #tpu.memory_space<vmem>>, %arg8: memref<2x8x5xf32, #tpu.memory_space<vmem>>, %arg9: memref<2x5x8xf32, #tpu.memory_space<vmem>>, %arg10: memref<8x1xf32, #tpu.memory_space<vmem>>, %arg11: memref<1x8xf32, #tpu.memory_space<vmem>>, %arg12: memref<16x8xf32, #tpu.memory_space<vmem>>, %arg13: memref<8x16xf32, #tpu.memory_space<vmem>>, %arg14: memref<16x16xf32, #tpu.memory_space<vmem>>) attributes {dimension_semantics = [#tpu.dimension_semantics<arbitrary>], iteration_bounds = array<i64: 1>, scalar_prefetch = 0 : i64, scratch_operands = 0 : i64, tpu.core_type = #tpu.core_type<tc>, window_params = [{transform_indices = @transform_0, window_bounds = array<i64: 1>}, {pipeline_mode = #tpu.pipeline_mode<synchronous>, transform_indices = @transform_1, window_bounds = array<i64: 2, 3, 3>}, {pipeline_mode = #tpu.pipeline_mode<synchronous>, transform_indices = @transform_2, window_bounds = array<i64: 2, 8, 3>}, {pipeline_mode = #tpu.pipeline_mode<synchronous>, transform_indices = @transform_3, window_bounds = array<i64: 2, 3, 8>}, {pipeline_mode = #tpu.pipeline_mode<synchronous>, transform_indices = @transform_4, window_bounds = array<i64: 8, 1>}, {pipeline_mode = #tpu.pipeline_mode<synchronous>, transform_indices = @transform_5, window_bounds = array<i64: 1, 8>}, {pipeline_mode = #tpu.pipeline_mode<synchronous>, transform_indices = @transform_6, window_bounds = array<i64: 2, 5, 5>}, {pipeline_mode = #tpu.pipeline_mode<synchronous>, transform_indices = @transform_7, window_bounds = array<i64: 2, 8, 5>}, {pipeline_mode = #tpu.pipeline_mode<synchronous>, transform_indices = @transform_8, window_bounds = array<i64: 2, 5, 8>}, {pipeline_mode = #tpu.pipeline_mode<synchronous>, transform_indices = @transform_9, window_bounds = array<i64: 8, 1>}, {pipeline_mode = #tpu.pipeline_mode<synchronous>, transform_indices = @transform_10, window_bounds = array<i64: 1, 8>}, {pipeline_mode = #tpu.pipeline_mode<synchronous>, transform_indices = @transform_11, window_bounds = array<i64: 16, 8>}, {pipeline_mode = #tpu.pipeline_mode<synchronous>, transform_indices = @transform_12, window_bounds = array<i64: 8, 16>}, {pipeline_mode = #tpu.pipeline_mode<synchronous>, transform_indices = @transform_13, window_bounds = array<i64: 16, 16>}]} {
    %c0 = arith.constant 0 : index
    %c0_0 = arith.constant 0 : index
    %c0_1 = arith.constant 0 : index
    %0 = vector.load %arg2[%c0, %c0_0, %c0_1] : memref<2x3x3xf32, #tpu.memory_space<vmem>>, vector<1x3x3xf32>
    %1 = vector.shape_cast %0 : vector<1x3x3xf32> to vector<3x3xf32>
    %c1 = arith.constant 1 : index
    %c0_2 = arith.constant 0 : index
    %c0_3 = arith.constant 0 : index
    %2 = vector.load %arg2[%c1, %c0_2, %c0_3] : memref<2x3x3xf32, #tpu.memory_space<vmem>>, vector<1x3x3xf32>
    %3 = vector.shape_cast %2 : vector<1x3x3xf32> to vector<3x3xf32>
    %c0_4 = arith.constant 0 : index
    %c0_5 = arith.constant 0 : index
    %c0_6 = arith.constant 0 : index
    %4 = vector.load %arg3[%c0_4, %c0_5, %c0_6] : memref<2x8x3xf32, #tpu.memory_space<vmem>>, vector<1x8x3xf32>
    %5 = vector.shape_cast %4 : vector<1x8x3xf32> to vector<8x3xf32>
    %c1_7 = arith.constant 1 : index
    %c0_8 = arith.constant 0 : index
    %c0_9 = arith.constant 0 : index
    %6 = vector.load %arg3[%c1_7, %c0_8, %c0_9] : memref<2x8x3xf32, #tpu.memory_space<vmem>>, vector<1x8x3xf32>
    %7 = vector.shape_cast %6 : vector<1x8x3xf32> to vector<8x3xf32>
    %c0_10 = arith.constant 0 : index
    %c0_11 = arith.constant 0 : index
    %c0_12 = arith.constant 0 : index
    %8 = vector.load %arg4[%c0_10, %c0_11, %c0_12] : memref<2x3x8xf32, #tpu.memory_space<vmem>>, vector<1x3x8xf32>
    %9 = vector.shape_cast %8 : vector<1x3x8xf32> to vector<3x8xf32>
    %c1_13 = arith.constant 1 : index
    %c0_14 = arith.constant 0 : index
    %c0_15 = arith.constant 0 : index
    %10 = vector.load %arg4[%c1_13, %c0_14, %c0_15] : memref<2x3x8xf32, #tpu.memory_space<vmem>>, vector<1x3x8xf32>
    %11 = vector.shape_cast %10 : vector<1x3x8xf32> to vector<3x8xf32>
    %c0_16 = arith.constant 0 : index
    %c0_17 = arith.constant 0 : index
    %12 = vector.load %arg5[%c0_16, %c0_17] : memref<8x1xf32, #tpu.memory_space<vmem>>, vector<8x1xf32>
    %c0_18 = arith.constant 0 : index
    %c0_19 = arith.constant 0 : index
    %13 = vector.load %arg6[%c0_18, %c0_19] : memref<1x8xf32, #tpu.memory_space<vmem>>, vector<1x8xf32>
    %cst = arith.constant dense<0.000000e+00> : vector<3x8xf32>
    %14 = tpu.matmul %1, %9, %cst {dimension_numbers = #tpu.dot_dimension_numbers<[1], [0], [0], [1], [0, 0, 1, 1], [], []>} : vector<3x3xf32>, vector<3x8xf32>, vector<3x8xf32> -> vector<3x8xf32>
    %cst_20 = arith.constant dense<0.000000e+00> : vector<3x8xf32>
    %15 = tpu.matmul %1, %11, %cst_20 {dimension_numbers = #tpu.dot_dimension_numbers<[1], [0], [0], [1], [0, 0, 1, 1], [], []>} : vector<3x3xf32>, vector<3x8xf32>, vector<3x8xf32> -> vector<3x8xf32>
    %cst_21 = arith.constant dense<0.000000e+00> : vector<3x8xf32>
    %16 = tpu.matmul %3, %9, %cst_21 {dimension_numbers = #tpu.dot_dimension_numbers<[1], [0], [0], [1], [0, 0, 1, 1], [], []>} : vector<3x3xf32>, vector<3x8xf32>, vector<3x8xf32> -> vector<3x8xf32>
    %cst_22 = arith.constant dense<0.000000e+00> : vector<3x8xf32>
    %17 = tpu.matmul %3, %11, %cst_22 {dimension_numbers = #tpu.dot_dimension_numbers<[1], [0], [0], [1], [0, 0, 1, 1], [], []>} : vector<3x3xf32>, vector<3x8xf32>, vector<3x8xf32> -> vector<3x8xf32>
    %cst_23 = arith.constant dense<0.000000e+00> : vector<8x8xf32>
    %18 = tpu.matmul %5, %14, %cst_23 {dimension_numbers = #tpu.dot_dimension_numbers<[1], [0], [0], [1], [0, 0, 1, 1], [], []>} : vector<8x3xf32>, vector<3x8xf32>, vector<8x8xf32> -> vector<8x8xf32>
    %19 = vector.broadcast %12 : vector<8x1xf32> to vector<8x8xf32>
    %20 = arith.mulf %19, %18 : vector<8x8xf32>
    %cst_24 = arith.constant dense<0.000000e+00> : vector<8x8xf32>
    %21 = tpu.matmul %5, %16, %cst_24 {dimension_numbers = #tpu.dot_dimension_numbers<[1], [0], [0], [1], [0, 0, 1, 1], [], []>} : vector<8x3xf32>, vector<3x8xf32>, vector<8x8xf32> -> vector<8x8xf32>
    %22 = vector.broadcast %13 : vector<1x8xf32> to vector<8x8xf32>
    %23 = arith.mulf %22, %21 : vector<8x8xf32>
    %24 = arith.addf %20, %23 : vector<8x8xf32>
    %cst_25 = arith.constant 1.000000e+00 : f32
    %25 = vector.broadcast %cst_25 : f32 to vector<8x1xf32>
    %26 = arith.subf %12, %25 : vector<8x1xf32>
    %cst_26 = arith.constant dense<0.000000e+00> : vector<8x8xf32>
    %27 = tpu.matmul %7, %14, %cst_26 {dimension_numbers = #tpu.dot_dimension_numbers<[1], [0], [0], [1], [0, 0, 1, 1], [], []>} : vector<8x3xf32>, vector<3x8xf32>, vector<8x8xf32> -> vector<8x8xf32>
    %28 = vector.broadcast %26 : vector<8x1xf32> to vector<8x8xf32>
    %29 = arith.mulf %28, %27 : vector<8x8xf32>
    %cst_27 = arith.constant dense<0.000000e+00> : vector<8x8xf32>
    %30 = tpu.matmul %7, %16, %cst_27 {dimension_numbers = #tpu.dot_dimension_numbers<[1], [0], [0], [1], [0, 0, 1, 1], [], []>} : vector<8x3xf32>, vector<3x8xf32>, vector<8x8xf32> -> vector<8x8xf32>
    %31 = vector.broadcast %13 : vector<1x8xf32> to vector<8x8xf32>
    %32 = arith.mulf %31, %30 : vector<8x8xf32>
    %33 = arith.addf %29, %32 : vector<8x8xf32>
    %cst_28 = arith.constant dense<0.000000e+00> : vector<8x8xf32>
    %34 = tpu.matmul %5, %15, %cst_28 {dimension_numbers = #tpu.dot_dimension_numbers<[1], [0], [0], [1], [0, 0, 1, 1], [], []>} : vector<8x3xf32>, vector<3x8xf32>, vector<8x8xf32> -> vector<8x8xf32>
    %35 = vector.broadcast %12 : vector<8x1xf32> to vector<8x8xf32>
    %36 = arith.mulf %35, %34 : vector<8x8xf32>
    %cst_29 = arith.constant 1.000000e+00 : f32
    %37 = vector.broadcast %cst_29 : f32 to vector<1x8xf32>
    %38 = arith.subf %13, %37 : vector<1x8xf32>
    %cst_30 = arith.constant dense<0.000000e+00> : vector<8x8xf32>
    %39 = tpu.matmul %5, %17, %cst_30 {dimension_numbers = #tpu.dot_dimension_numbers<[1], [0], [0], [1], [0, 0, 1, 1], [], []>} : vector<8x3xf32>, vector<3x8xf32>, vector<8x8xf32> -> vector<8x8xf32>
    %40 = vector.broadcast %38 : vector<1x8xf32> to vector<8x8xf32>
    %41 = arith.mulf %40, %39 : vector<8x8xf32>
    %42 = arith.addf %36, %41 : vector<8x8xf32>
    %cst_31 = arith.constant 1.000000e+00 : f32
    %43 = vector.broadcast %cst_31 : f32 to vector<8x1xf32>
    %44 = arith.subf %12, %43 : vector<8x1xf32>
    %cst_32 = arith.constant dense<0.000000e+00> : vector<8x8xf32>
    %45 = tpu.matmul %7, %15, %cst_32 {dimension_numbers = #tpu.dot_dimension_numbers<[1], [0], [0], [1], [0, 0, 1, 1], [], []>} : vector<8x3xf32>, vector<3x8xf32>, vector<8x8xf32> -> vector<8x8xf32>
    %46 = vector.broadcast %44 : vector<8x1xf32> to vector<8x8xf32>
    %47 = arith.mulf %46, %45 : vector<8x8xf32>
    %cst_33 = arith.constant 1.000000e+00 : f32
    %48 = vector.broadcast %cst_33 : f32 to vector<1x8xf32>
    %49 = arith.subf %13, %48 : vector<1x8xf32>
    %cst_34 = arith.constant dense<0.000000e+00> : vector<8x8xf32>
    %50 = tpu.matmul %7, %17, %cst_34 {dimension_numbers = #tpu.dot_dimension_numbers<[1], [0], [0], [1], [0, 0, 1, 1], [], []>} : vector<8x3xf32>, vector<3x8xf32>, vector<8x8xf32> -> vector<8x8xf32>
    %51 = vector.broadcast %49 : vector<1x8xf32> to vector<8x8xf32>
    %52 = arith.mulf %51, %50 : vector<8x8xf32>
    %53 = arith.addf %47, %52 : vector<8x8xf32>
    %cst_35 = arith.constant 3.000000e+00 : f32
    %54 = vector.broadcast %cst_35 : f32 to vector<8x1xf32>
    %55 = arith.mulf %54, %12 : vector<8x1xf32>
    %56 = arith.mulf %55, %12 : vector<8x1xf32>
    %cst_36 = arith.constant 2.000000e+00 : f32
    %57 = vector.broadcast %cst_36 : f32 to vector<8x1xf32>
    %58 = arith.mulf %57, %12 : vector<8x1xf32>
    %59 = arith.mulf %58, %12 : vector<8x1xf32>
    %60 = arith.mulf %59, %12 : vector<8x1xf32>
    %61 = arith.subf %56, %60 : vector<8x1xf32>
    %cst_37 = arith.constant 3.000000e+00 : f32
    %62 = vector.broadcast %cst_37 : f32 to vector<1x8xf32>
    %63 = arith.mulf %62, %13 : vector<1x8xf32>
    %64 = arith.mulf %63, %13 : vector<1x8xf32>
    %cst_38 = arith.constant 2.000000e+00 : f32
    %65 = vector.broadcast %cst_38 : f32 to vector<1x8xf32>
    %66 = arith.mulf %65, %13 : vector<1x8xf32>
    %67 = arith.mulf %66, %13 : vector<1x8xf32>
    %68 = arith.mulf %67, %13 : vector<1x8xf32>
    %69 = arith.subf %64, %68 : vector<1x8xf32>
    %70 = arith.subf %33, %24 : vector<8x8xf32>
    %71 = vector.broadcast %61 : vector<8x1xf32> to vector<8x8xf32>
    %72 = arith.mulf %70, %71 : vector<8x8xf32>
    %73 = arith.addf %24, %72 : vector<8x8xf32>
    %74 = arith.subf %53, %42 : vector<8x8xf32>
    %75 = vector.broadcast %61 : vector<8x1xf32> to vector<8x8xf32>
    %76 = arith.mulf %74, %75 : vector<8x8xf32>
    %77 = arith.addf %42, %76 : vector<8x8xf32>
    %78 = arith.subf %77, %73 : vector<8x8xf32>
    %79 = vector.broadcast %69 : vector<1x8xf32> to vector<8x8xf32>
    %80 = arith.mulf %78, %79 : vector<8x8xf32>
    %81 = arith.addf %73, %80 : vector<8x8xf32>
    %82 = vector.shape_cast %81 : vector<8x8xf32> to vector<1x8x8xf32>
    %cst_39 = arith.constant dense<0x7F800000> : vector<1xf32>
    %83 = vector.multi_reduction <minimumf>, %82, %cst_39 [1, 2] : vector<1x8x8xf32> to vector<1xf32>
    %84 = vector.shape_cast %83 : vector<1xf32> to vector<1x1x1xf32>
    %85 = vector.extract %84[0, 0, 0] : f32 from vector<1x1x1xf32>
    %86 = vector.broadcast %85 : f32 to vector<1x1xf32>
    %87 = vector.shape_cast %81 : vector<8x8xf32> to vector<1x8x8xf32>
    %cst_40 = arith.constant dense<0xFF800000> : vector<1xf32>
    %88 = vector.multi_reduction <maximumf>, %87, %cst_40 [1, 2] : vector<1x8x8xf32> to vector<1xf32>
    %89 = vector.shape_cast %88 : vector<1xf32> to vector<1x1x1xf32>
    %90 = vector.extract %89[0, 0, 0] : f32 from vector<1x1x1xf32>
    %91 = vector.broadcast %90 : f32 to vector<1x1xf32>
    %92 = vector.broadcast %86 : vector<1x1xf32> to vector<8x8xf32>
    %93 = arith.subf %81, %92 : vector<8x8xf32>
    %94 = arith.subf %91, %86 : vector<1x1xf32>
    %95 = tpu.reciprocal %94 {approx = true} : vector<1x1xf32> -> vector<1x1xf32>
    %96 = vector.broadcast %95 : vector<1x1xf32> to vector<8x8xf32>
    %97 = arith.mulf %93, %96 : vector<8x8xf32>
    %cst_41 = arith.constant 2.000000e+00 : f32
    %98 = vector.broadcast %cst_41 : f32 to vector<8x8xf32>
    %99 = arith.mulf %97, %98 : vector<8x8xf32>
    %cst_42 = arith.constant 1.000000e+00 : f32
    %100 = vector.broadcast %cst_42 : f32 to vector<8x8xf32>
    %101 = arith.subf %99, %100 : vector<8x8xf32>
    %cst_43 = arith.constant 1.000000e-01 : f32
    %102 = vector.broadcast %cst_43 : f32 to vector<8x8xf32>
    %103 = arith.mulf %101, %102 : vector<8x8xf32>
    %c0_44 = arith.constant 0 : index
    %c0_45 = arith.constant 0 : index
    %c0_46 = arith.constant 0 : index
    %104 = vector.load %arg7[%c0_44, %c0_45, %c0_46] : memref<2x5x5xf32, #tpu.memory_space<vmem>>, vector<1x5x5xf32>
    %105 = vector.shape_cast %104 : vector<1x5x5xf32> to vector<5x5xf32>
    %c1_47 = arith.constant 1 : index
    %c0_48 = arith.constant 0 : index
    %c0_49 = arith.constant 0 : index
    %106 = vector.load %arg7[%c1_47, %c0_48, %c0_49] : memref<2x5x5xf32, #tpu.memory_space<vmem>>, vector<1x5x5xf32>
    %107 = vector.shape_cast %106 : vector<1x5x5xf32> to vector<5x5xf32>
    %c0_50 = arith.constant 0 : index
    %c0_51 = arith.constant 0 : index
    %c0_52 = arith.constant 0 : index
    %108 = vector.load %arg8[%c0_50, %c0_51, %c0_52] : memref<2x8x5xf32, #tpu.memory_space<vmem>>, vector<1x8x5xf32>
    %109 = vector.shape_cast %108 : vector<1x8x5xf32> to vector<8x5xf32>
    %c1_53 = arith.constant 1 : index
    %c0_54 = arith.constant 0 : index
    %c0_55 = arith.constant 0 : index
    %110 = vector.load %arg8[%c1_53, %c0_54, %c0_55] : memref<2x8x5xf32, #tpu.memory_space<vmem>>, vector<1x8x5xf32>
    %111 = vector.shape_cast %110 : vector<1x8x5xf32> to vector<8x5xf32>
    %c0_56 = arith.constant 0 : index
    %c0_57 = arith.constant 0 : index
    %c0_58 = arith.constant 0 : index
    %112 = vector.load %arg9[%c0_56, %c0_57, %c0_58] : memref<2x5x8xf32, #tpu.memory_space<vmem>>, vector<1x5x8xf32>
    %113 = vector.shape_cast %112 : vector<1x5x8xf32> to vector<5x8xf32>
    %c1_59 = arith.constant 1 : index
    %c0_60 = arith.constant 0 : index
    %c0_61 = arith.constant 0 : index
    %114 = vector.load %arg9[%c1_59, %c0_60, %c0_61] : memref<2x5x8xf32, #tpu.memory_space<vmem>>, vector<1x5x8xf32>
    %115 = vector.shape_cast %114 : vector<1x5x8xf32> to vector<5x8xf32>
    %c0_62 = arith.constant 0 : index
    %c0_63 = arith.constant 0 : index
    %116 = vector.load %arg10[%c0_62, %c0_63] : memref<8x1xf32, #tpu.memory_space<vmem>>, vector<8x1xf32>
    %c0_64 = arith.constant 0 : index
    %c0_65 = arith.constant 0 : index
    %117 = vector.load %arg11[%c0_64, %c0_65] : memref<1x8xf32, #tpu.memory_space<vmem>>, vector<1x8xf32>
    %cst_66 = arith.constant dense<0.000000e+00> : vector<5x8xf32>
    %118 = tpu.matmul %105, %113, %cst_66 {dimension_numbers = #tpu.dot_dimension_numbers<[1], [0], [0], [1], [0, 0, 1, 1], [], []>} : vector<5x5xf32>, vector<5x8xf32>, vector<5x8xf32> -> vector<5x8xf32>
    %cst_67 = arith.constant dense<0.000000e+00> : vector<5x8xf32>
    %119 = tpu.matmul %105, %115, %cst_67 {dimension_numbers = #tpu.dot_dimension_numbers<[1], [0], [0], [1], [0, 0, 1, 1], [], []>} : vector<5x5xf32>, vector<5x8xf32>, vector<5x8xf32> -> vector<5x8xf32>
    %cst_68 = arith.constant dense<0.000000e+00> : vector<5x8xf32>
    %120 = tpu.matmul %107, %113, %cst_68 {dimension_numbers = #tpu.dot_dimension_numbers<[1], [0], [0], [1], [0, 0, 1, 1], [], []>} : vector<5x5xf32>, vector<5x8xf32>, vector<5x8xf32> -> vector<5x8xf32>
    %cst_69 = arith.constant dense<0.000000e+00> : vector<5x8xf32>
    %121 = tpu.matmul %107, %115, %cst_69 {dimension_numbers = #tpu.dot_dimension_numbers<[1], [0], [0], [1], [0, 0, 1, 1], [], []>} : vector<5x5xf32>, vector<5x8xf32>, vector<5x8xf32> -> vector<5x8xf32>
    %cst_70 = arith.constant dense<0.000000e+00> : vector<8x8xf32>
    %122 = tpu.matmul %109, %118, %cst_70 {dimension_numbers = #tpu.dot_dimension_numbers<[1], [0], [0], [1], [0, 0, 1, 1], [], []>} : vector<8x5xf32>, vector<5x8xf32>, vector<8x8xf32> -> vector<8x8xf32>
    %123 = vector.broadcast %116 : vector<8x1xf32> to vector<8x8xf32>
    %124 = arith.mulf %123, %122 : vector<8x8xf32>
    %cst_71 = arith.constant dense<0.000000e+00> : vector<8x8xf32>
    %125 = tpu.matmul %109, %120, %cst_71 {dimension_numbers = #tpu.dot_dimension_numbers<[1], [0], [0], [1], [0, 0, 1, 1], [], []>} : vector<8x5xf32>, vector<5x8xf32>, vector<8x8xf32> -> vector<8x8xf32>
    %126 = vector.broadcast %117 : vector<1x8xf32> to vector<8x8xf32>
    %127 = arith.mulf %126, %125 : vector<8x8xf32>
    %128 = arith.addf %124, %127 : vector<8x8xf32>
    %cst_72 = arith.constant 1.000000e+00 : f32
    %129 = vector.broadcast %cst_72 : f32 to vector<8x1xf32>
    %130 = arith.subf %116, %129 : vector<8x1xf32>
    %cst_73 = arith.constant dense<0.000000e+00> : vector<8x8xf32>
    %131 = tpu.matmul %111, %118, %cst_73 {dimension_numbers = #tpu.dot_dimension_numbers<[1], [0], [0], [1], [0, 0, 1, 1], [], []>} : vector<8x5xf32>, vector<5x8xf32>, vector<8x8xf32> -> vector<8x8xf32>
    %132 = vector.broadcast %130 : vector<8x1xf32> to vector<8x8xf32>
    %133 = arith.mulf %132, %131 : vector<8x8xf32>
    %cst_74 = arith.constant dense<0.000000e+00> : vector<8x8xf32>
    %134 = tpu.matmul %111, %120, %cst_74 {dimension_numbers = #tpu.dot_dimension_numbers<[1], [0], [0], [1], [0, 0, 1, 1], [], []>} : vector<8x5xf32>, vector<5x8xf32>, vector<8x8xf32> -> vector<8x8xf32>
    %135 = vector.broadcast %117 : vector<1x8xf32> to vector<8x8xf32>
    %136 = arith.mulf %135, %134 : vector<8x8xf32>
    %137 = arith.addf %133, %136 : vector<8x8xf32>
    %cst_75 = arith.constant dense<0.000000e+00> : vector<8x8xf32>
    %138 = tpu.matmul %109, %119, %cst_75 {dimension_numbers = #tpu.dot_dimension_numbers<[1], [0], [0], [1], [0, 0, 1, 1], [], []>} : vector<8x5xf32>, vector<5x8xf32>, vector<8x8xf32> -> vector<8x8xf32>
    %139 = vector.broadcast %116 : vector<8x1xf32> to vector<8x8xf32>
    %140 = arith.mulf %139, %138 : vector<8x8xf32>
    %cst_76 = arith.constant 1.000000e+00 : f32
    %141 = vector.broadcast %cst_76 : f32 to vector<1x8xf32>
    %142 = arith.subf %117, %141 : vector<1x8xf32>
    %cst_77 = arith.constant dense<0.000000e+00> : vector<8x8xf32>
    %143 = tpu.matmul %109, %121, %cst_77 {dimension_numbers = #tpu.dot_dimension_numbers<[1], [0], [0], [1], [0, 0, 1, 1], [], []>} : vector<8x5xf32>, vector<5x8xf32>, vector<8x8xf32> -> vector<8x8xf32>
    %144 = vector.broadcast %142 : vector<1x8xf32> to vector<8x8xf32>
    %145 = arith.mulf %144, %143 : vector<8x8xf32>
    %146 = arith.addf %140, %145 : vector<8x8xf32>
    %cst_78 = arith.constant 1.000000e+00 : f32
    %147 = vector.broadcast %cst_78 : f32 to vector<8x1xf32>
    %148 = arith.subf %116, %147 : vector<8x1xf32>
    %cst_79 = arith.constant dense<0.000000e+00> : vector<8x8xf32>
    %149 = tpu.matmul %111, %119, %cst_79 {dimension_numbers = #tpu.dot_dimension_numbers<[1], [0], [0], [1], [0, 0, 1, 1], [], []>} : vector<8x5xf32>, vector<5x8xf32>, vector<8x8xf32> -> vector<8x8xf32>
    %150 = vector.broadcast %148 : vector<8x1xf32> to vector<8x8xf32>
    %151 = arith.mulf %150, %149 : vector<8x8xf32>
    %cst_80 = arith.constant 1.000000e+00 : f32
    %152 = vector.broadcast %cst_80 : f32 to vector<1x8xf32>
    %153 = arith.subf %117, %152 : vector<1x8xf32>
    %cst_81 = arith.constant dense<0.000000e+00> : vector<8x8xf32>
    %154 = tpu.matmul %111, %121, %cst_81 {dimension_numbers = #tpu.dot_dimension_numbers<[1], [0], [0], [1], [0, 0, 1, 1], [], []>} : vector<8x5xf32>, vector<5x8xf32>, vector<8x8xf32> -> vector<8x8xf32>
    %155 = vector.broadcast %153 : vector<1x8xf32> to vector<8x8xf32>
    %156 = arith.mulf %155, %154 : vector<8x8xf32>
    %157 = arith.addf %151, %156 : vector<8x8xf32>
    %cst_82 = arith.constant 3.000000e+00 : f32
    %158 = vector.broadcast %cst_82 : f32 to vector<8x1xf32>
    %159 = arith.mulf %158, %116 : vector<8x1xf32>
    %160 = arith.mulf %159, %116 : vector<8x1xf32>
    %cst_83 = arith.constant 2.000000e+00 : f32
    %161 = vector.broadcast %cst_83 : f32 to vector<8x1xf32>
    %162 = arith.mulf %161, %116 : vector<8x1xf32>
    %163 = arith.mulf %162, %116 : vector<8x1xf32>
    %164 = arith.mulf %163, %116 : vector<8x1xf32>
    %165 = arith.subf %160, %164 : vector<8x1xf32>
    %cst_84 = arith.constant 3.000000e+00 : f32
    %166 = vector.broadcast %cst_84 : f32 to vector<1x8xf32>
    %167 = arith.mulf %166, %117 : vector<1x8xf32>
    %168 = arith.mulf %167, %117 : vector<1x8xf32>
    %cst_85 = arith.constant 2.000000e+00 : f32
    %169 = vector.broadcast %cst_85 : f32 to vector<1x8xf32>
    %170 = arith.mulf %169, %117 : vector<1x8xf32>
    %171 = arith.mulf %170, %117 : vector<1x8xf32>
    %172 = arith.mulf %171, %117 : vector<1x8xf32>
    %173 = arith.subf %168, %172 : vector<1x8xf32>
    %174 = arith.subf %137, %128 : vector<8x8xf32>
    %175 = vector.broadcast %165 : vector<8x1xf32> to vector<8x8xf32>
    %176 = arith.mulf %174, %175 : vector<8x8xf32>
    %177 = arith.addf %128, %176 : vector<8x8xf32>
    %178 = arith.subf %157, %146 : vector<8x8xf32>
    %179 = vector.broadcast %165 : vector<8x1xf32> to vector<8x8xf32>
    %180 = arith.mulf %178, %179 : vector<8x8xf32>
    %181 = arith.addf %146, %180 : vector<8x8xf32>
    %182 = arith.subf %181, %177 : vector<8x8xf32>
    %183 = vector.broadcast %173 : vector<1x8xf32> to vector<8x8xf32>
    %184 = arith.mulf %182, %183 : vector<8x8xf32>
    %185 = arith.addf %177, %184 : vector<8x8xf32>
    %186 = vector.shape_cast %185 : vector<8x8xf32> to vector<1x8x8xf32>
    %cst_86 = arith.constant dense<0x7F800000> : vector<1xf32>
    %187 = vector.multi_reduction <minimumf>, %186, %cst_86 [1, 2] : vector<1x8x8xf32> to vector<1xf32>
    %188 = vector.shape_cast %187 : vector<1xf32> to vector<1x1x1xf32>
    %189 = vector.extract %188[0, 0, 0] : f32 from vector<1x1x1xf32>
    %190 = vector.broadcast %189 : f32 to vector<1x1xf32>
    %191 = vector.shape_cast %185 : vector<8x8xf32> to vector<1x8x8xf32>
    %cst_87 = arith.constant dense<0xFF800000> : vector<1xf32>
    %192 = vector.multi_reduction <maximumf>, %191, %cst_87 [1, 2] : vector<1x8x8xf32> to vector<1xf32>
    %193 = vector.shape_cast %192 : vector<1xf32> to vector<1x1x1xf32>
    %194 = vector.extract %193[0, 0, 0] : f32 from vector<1x1x1xf32>
    %195 = vector.broadcast %194 : f32 to vector<1x1xf32>
    %196 = vector.broadcast %190 : vector<1x1xf32> to vector<8x8xf32>
    %197 = arith.subf %185, %196 : vector<8x8xf32>
    %198 = arith.subf %195, %190 : vector<1x1xf32>
    %199 = tpu.reciprocal %198 {approx = true} : vector<1x1xf32> -> vector<1x1xf32>
    %200 = vector.broadcast %199 : vector<1x1xf32> to vector<8x8xf32>
    %201 = arith.mulf %197, %200 : vector<8x8xf32>
    %cst_88 = arith.constant 2.000000e+00 : f32
    %202 = vector.broadcast %cst_88 : f32 to vector<8x8xf32>
    %203 = arith.mulf %201, %202 : vector<8x8xf32>
    %cst_89 = arith.constant 1.000000e+00 : f32
    %204 = vector.broadcast %cst_89 : f32 to vector<8x8xf32>
    %205 = arith.subf %203, %204 : vector<8x8xf32>
    %cst_90 = arith.constant 5.000000e-02 : f32
    %206 = vector.broadcast %cst_90 : f32 to vector<8x8xf32>
    %207 = arith.mulf %205, %206 : vector<8x8xf32>
    %208 = arith.addf %103, %207 : vector<8x8xf32>
    %c0_91 = arith.constant 0 : index
    %c0_92 = arith.constant 0 : index
    %209 = vector.load %arg12[%c0_91, %c0_92] : memref<16x8xf32, #tpu.memory_space<vmem>>, vector<16x8xf32>
    %cst_93 = arith.constant dense<0.000000e+00> : vector<16x8xf32>
    %210 = tpu.matmul %209, %208, %cst_93 {dimension_numbers = #tpu.dot_dimension_numbers<[1], [0], [0], [1], [0, 0, 1, 1], [], []>} : vector<16x8xf32>, vector<8x8xf32>, vector<16x8xf32> -> vector<16x8xf32>
    %c0_94 = arith.constant 0 : index
    %c0_95 = arith.constant 0 : index
    %211 = vector.load %arg13[%c0_94, %c0_95] : memref<8x16xf32, #tpu.memory_space<vmem>>, vector<8x16xf32>
    %cst_96 = arith.constant dense<0.000000e+00> : vector<16x16xf32>
    %212 = tpu.matmul %210, %211, %cst_96 {dimension_numbers = #tpu.dot_dimension_numbers<[1], [0], [0], [1], [0, 0, 1, 1], [], []>} : vector<16x8xf32>, vector<8x16xf32>, vector<16x16xf32> -> vector<16x16xf32>
    %c0_97 = arith.constant 0 : index
    %213 = memref.load %arg1[%c0_97] : memref<1xf32, #tpu.memory_space<smem>>
    %214 = vector.broadcast %213 : f32 to vector<16x16xf32>
    %215 = arith.mulf %212, %214 : vector<16x16xf32>
    %c0_98 = arith.constant 0 : index
    %c0_99 = arith.constant 0 : index
    %216 = vector.load %arg14[%c0_98, %c0_99] : memref<16x16xf32, #tpu.memory_space<vmem>>, vector<16x16xf32>
    tpu.vector_store %arg14[%c0_98, %c0_99], %215 {strides = array<i32>} : memref<16x16xf32, #tpu.memory_space<vmem>>, vector<16x16xf32>,
    return
  }
  func.func @transform_0(%arg0: i32) -> i32 {
    %c0_i32 = arith.constant 0 : i32
    %c0_i32_0 = arith.constant 0 : i32
    return %c0_i32 : i32
  }
  func.func @transform_1(%arg0: i32) -> (i32, i32, i32) {
    %c0_i32 = arith.constant 0 : i32
    %c0_i32_0 = arith.constant 0 : i32
    %c0_i32_1 = arith.constant 0 : i32
    %c0_i32_2 = arith.constant 0 : i32
    return %c0_i32, %c0_i32_0, %c0_i32_1 : i32, i32, i32
  }
  func.func @transform_2(%arg0: i32) -> (i32, i32, i32) {
    %c0_i32 = arith.constant 0 : i32
    %c0_i32_0 = arith.constant 0 : i32
    %c0_i32_1 = arith.constant 0 : i32
    %c0_i32_2 = arith.constant 0 : i32
    return %c0_i32, %c0_i32_0, %c0_i32_1 : i32, i32, i32
  }
  func.func @transform_3(%arg0: i32) -> (i32, i32, i32) {
    %c0_i32 = arith.constant 0 : i32
    %c0_i32_0 = arith.constant 0 : i32
    %c0_i32_1 = arith.constant 0 : i32
    %c0_i32_2 = arith.constant 0 : i32
    return %c0_i32, %c0_i32_0, %c0_i32_1 : i32, i32, i32
  }
  func.func @transform_4(%arg0: i32) -> (i32, i32) {
    %c0_i32 = arith.constant 0 : i32
    %c0_i32_0 = arith.constant 0 : i32
    %c0_i32_1 = arith.constant 0 : i32
    return %c0_i32, %c0_i32_0 : i32, i32
  }
  func.func @transform_5(%arg0: i32) -> (i32, i32) {
    %c0_i32 = arith.constant 0 : i32
    %c0_i32_0 = arith.constant 0 : i32
    %c0_i32_1 = arith.constant 0 : i32
    return %c0_i32, %c0_i32_0 : i32, i32
  }
  func.func @transform_6(%arg0: i32) -> (i32, i32, i32) {
    %c0_i32 = arith.constant 0 : i32
    %c0_i32_0 = arith.constant 0 : i32
    %c0_i32_1 = arith.constant 0 : i32
    %c0_i32_2 = arith.constant 0 : i32
    return %c0_i32, %c0_i32_0, %c0_i32_1 : i32, i32, i32
  }
  func.func @transform_7(%arg0: i32) -> (i32, i32, i32) {
    %c0_i32 = arith.constant 0 : i32
    %c0_i32_0 = arith.constant 0 : i32
    %c0_i32_1 = arith.constant 0 : i32
    %c0_i32_2 = arith.constant 0 : i32
    return %c0_i32, %c0_i32_0, %c0_i32_1 : i32, i32, i32
  }
  func.func @transform_8(%arg0: i32) -> (i32, i32, i32) {
    %c0_i32 = arith.constant 0 : i32
    %c0_i32_0 = arith.constant 0 : i32
    %c0_i32_1 = arith.constant 0 : i32
    %c0_i32_2 = arith.constant 0 : i32
    return %c0_i32, %c0_i32_0, %c0_i32_1 : i32, i32, i32
  }
  func.func @transform_9(%arg0: i32) -> (i32, i32) {
    %c0_i32 = arith.constant 0 : i32
    %c0_i32_0 = arith.constant 0 : i32
    %c0_i32_1 = arith.constant 0 : i32
    return %c0_i32, %c0_i32_0 : i32, i32
  }
  func.func @transform_10(%arg0: i32) -> (i32, i32) {
    %c0_i32 = arith.constant 0 : i32
    %c0_i32_0 = arith.constant 0 : i32
    %c0_i32_1 = arith.constant 0 : i32
    return %c0_i32, %c0_i32_0 : i32, i32
  }
  func.func @transform_11(%arg0: i32) -> (i32, i32) {
    %c0_i32 = arith.constant 0 : i32
    %c0_i32_0 = arith.constant 0 : i32
    %c0_i32_1 = arith.constant 0 : i32
    return %c0_i32, %c0_i32_0 : i32, i32
  }
  func.func @transform_12(%arg0: i32) -> (i32, i32) {
    %c0_i32 = arith.constant 0 : i32
    %c0_i32_0 = arith.constant 0 : i32
    %c0_i32_1 = arith.constant 0 : i32
    return %c0_i32, %c0_i32_0 : i32, i32
  }
  func.func @transform_13(%arg0: i32) -> (i32, i32) {
    %c0_i32 = arith.constant 0 : i32
    %c0_i32_0 = arith.constant 0 : i32
    %c0_i32_1 = arith.constant 0 : i32
    return %c0_i32, %c0_i32_0 : i32, i32
  }
}

</mosaic_0001>

<bundles_post_ra>
// kernel: _forward.3
= control target key start
LH: loop header
LB: loop body
LE: loop exit
PB: predicated region body
PF: predicated region fallthrough
CT: control target
= control target key end

     0   :  { %v15_v0 = vlaneseq  ;;  %s67_s0 = inlined_call_operand.vmem [shape: f32[1,256], index: 0, kind: input, shape index: {}]   ;;  %s68_s1 = inlined_call_operand.vmem [shape: f32[8,256], index: 1, kind: input, shape index: {}, may-alias: {1,2}]   ;;  %s69_s2 = inlined_call_operand.vmem [shape: f32[8,256], index: 2, kind: output, shape index: {}, may-alias: {1,2}]  }
   0x1   :  { %v13_v2 = vld [vmem:[%s67_s0] sm:$0x3]  ;;  %v12_v6 = vld [vmem:[%s68_s1 + $0x8] sm:$0xff] }
   0x2   :  { %v16_v1 = vshrl.u32 %v15_v0, 7  ;;  %v11_v5 = vld [vmem:[%s68_s1] sm:$0xff] }
   0x4   :  { %v17_v3 = vsub.s32 0, %v16_v1  ;;  %v21_v4 = vsub.s32 1, %v16_v1 }
   0x6   :  { %v18_v7 = vrot.slane %v13_v2, %v17_v3  ;;  %v22_v8 = vrot.slane %v13_v2, %v21_v4 }
   0x8   :  { %v25_v9 = vadd.f32 %v18_v7, %v11_v5  ;;  %v26_v10 = vadd.f32 %v22_v8, %v12_v6 }
   0xa   :  { %v27_v11 = vmax.f32 %v25_v9, 0.0  ;;  %v28_v12 = vmax.f32 %v26_v10, 0.0 }
   0xc   :  { %v29_v13 = vmin.f32 %v27_v11, 1.0  ;;  %v30_v14 = vmin.f32 %v28_v12, 1.0 }
   0xe   :  { %31 = vst [vmem:[%s69_s2] sm:$0xff] %v29_v13  ;;  %32 = vst [vmem:[%s69_s2 + $0x8] sm:$0xff] %v30_v14 }

// kernel: _forward.2
= control target key start
LH: loop header
LB: loop body
LE: loop exit
PB: predicated region body
PF: predicated region fallthrough
CT: control target
= control target key end

     0   :  { %vm60_vm0 = vcmask 1042432   ;;  %vm56_vm1 = vcmask 23552   ;;  %v2448_v0 = vmov 0.0   ;;  %vm2449_vm2 = vmmov 0   ;;  %s2728_s3 = inlined_call_operand.vmem [shape: f32[2,3,8], index: 3, kind: input, shape index: {}]   ;;  %s2729_s1 = inlined_call_operand.vmem [shape: f32[2,3,3], index: 1, kind: input, shape index: {}]   ;;  %s2730_s4 = inlined_call_operand.vmem [shape: f32[8,1], index: 4, kind: input, shape index: {}]   ;;  %s2731_s9 = inlined_call_operand.vmem [shape: f32[8,1], index: 9, kind: input, shape index: {}]   ;;  %s2732_s2 = inlined_call_operand.vmem [shape: f32[2,8,3], index: 2, kind: input, shape index: {}]   ;;  %s2733_s8 = inlined_call_operand.vmem [shape: f32[2,5,8], index: 8, kind: input, shape index: {}]   ;;  %s2734_s6 = inlined_call_operand.vmem [shape: f32[2,5,5], index: 6, kind: input, shape index: {}]   ;;  %s2735_s5 = inlined_call_operand.vmem [shape: f32[1,8], index: 5, kind: input, shape index: {}]   ;;  %s2736_s7 = inlined_call_operand.vmem [shape: f32[2,8,5], index: 7, kind: input, shape index: {}]   ;;  %s2737_s10 = inlined_call_operand.vmem [shape: f32[1,8], index: 10, kind: input, shape index: {}]   ;;  %s2738_s11 = inlined_call_operand.vmem [shape: f32[16,8], index: 11, kind: input, shape index: {}]   ;;  %s2739_s12 = inlined_call_operand.vmem [shape: f32[8,16], index: 12, kind: input, shape index: {}]   ;;  %s2740_s0 = inlined_call_operand.<no memory space> [shape: f32[1], index: 0, kind: input, shape index: {}]   ;;  %s2741_s13 = inlined_call_operand.vmem [shape: f32[16,16], index: 13, kind: output, shape index: {}]  }
   0x1   :  { %2301 = vmatprep.subr.mxu0 %v2448_v0  ;;  %v51_v1 = vld [vmem:[%s2728_s3] sm:$0x7]  ;;  %2303 = vmatprep.mubr.msk.f32.mxu0 %vm2449_vm2, %v2448_v0  ;;  %v2185_v3 = vld [vmem:[%s2728_s3 + $0x4] sm:$0x7]  ;;  %v2450_v5 = vmov 0   ;;  %v2184_v25 = vld [vmem:[%s2732_s2 + $0x8] sm:$0xff]  ;;  %v506_v36 = vlaneseq }
   0x2   :  { %v45_v2 = vld [vmem:[%s2729_s1] sm:$0x7]  ;;  %2302 = vmatpush3.msk.msra.mxu0 %vm60_vm0, %v51_v1  ;;  %2306 = vmatprep.subr.mxu1 %v2448_v0  ;;  %v2183_v4 = vld [vmem:[%s2729_s1 + $0x4] sm:$0x7]  ;;  %vm1041_vm3 = vcmask 1044480   ;;  %vm1037_vm4 = vcmask 39936  }
   0x3   :  { %2304 = vmatmul.mubr.msk.f32.vlgmr.msra.gmra.mrb[0].mxu0 %vm56_vm1, %v45_v2  ;;  %2311 = vmatprep.subr.mxu0 %v2448_v0  ;;  %v54_v6 = vld [vmem:[%s2730_s4] sm:$0xff]  ;;  %v2215_v34 = vld [vmem:[%s2733_s8 + $0x8] sm:$0x1f]  ;;  %v507_v37 = vshrl.u32 %v506_v36, 7  ;;  %vm996_vm5 = vcmask 64512   ;;  %vm2176_vm6 = vcmask 130048  }
   0x4   :  { %2312 = vmatpush3.msk.msra.mxu0 %vm60_vm0, %v51_v1  ;;  %2313 = vmatprep.mubr.msk.f32.mxu0 %vm2449_vm2, %v2448_v0  ;;  %v1035_v7 = vld [vmem:[%s2731_s9] sm:$0xff]  ;;  %v2198_v8 = vadd.f32 -1.0, %v54_v6  ;;  %v964_v9 = vmul.f32 3.0, %v54_v6  ;;  %v966_v10 = vmul.f32 2.0, %v54_v6  ;;  %v2213_v35 = vld [vmem:[%s2734_s6 + $0x8] sm:$0x1f] }
   0x5   :  { %2307 = vmatpush3.msk.msra.mxu1 %vm60_vm0, %v2185_v3  ;;  %2308 = vmatprep.mubr.msk.f32.mxu1 %vm2449_vm2, %v2448_v0  ;;  %v2228_v11 = vadd.f32 -1.0, %v1035_v7  ;;  %v1945_v12 = vmul.f32 3.0, %v1035_v7  ;;  %v1947_v13 = vmul.f32 2.0, %v1035_v7  ;;  %v48_v22 = vld [vmem:[%s2732_s2] sm:$0xff]  ;;  %v2643_v38 = vsub.s32 0, %v507_v37 }
   0x6   :  { %2309 = vmatmul.mubr.msk.f32.vlgmr.msra.gmra.mrb[0].mxu1 %vm56_vm1, %v45_v2  ;;  %2316 = vmatprep.subr.mxu1 %v2448_v0  ;;  %v965_v14 = vmul.f32 %v964_v9, %v54_v6  ;;  %v967_v15 = vmul.f32 %v966_v10, %v54_v6  ;;  %v1032_v32 = vld [vmem:[%s2733_s8] sm:$0x1f] }
   0x7   :  { %2314 = vmatmul.mubr.msk.f32.vlgmr.msra.gmra.mrb[2].mxu0 %vm56_vm1, %v2183_v4  ;;  %2317 = vmatpush3.msk.msra.mxu1 %vm60_vm0, %v2185_v3  ;;  %v1946_v16 = vmul.f32 %v1945_v12, %v1035_v7  ;;  %v1948_v17 = vmul.f32 %v1947_v13, %v1035_v7  ;;  %v1026_v33 = vld [vmem:[%s2734_s6] sm:$0x1f] }
   0x8   :  { %2318 = vmatprep.mubr.msk.f32.mxu1 %vm2449_vm2, %v2448_v0  ;;  %2321 = vmatprep.subr.mxu0 %v2448_v0  ;;  %v968_v18 = vmul.f32 %v967_v15, %v54_v6  ;;  %v55_v39 = vld [vmem:[%s2735_s5] sm:$0x1] }
   0x9   :  { %2323 = vmatprep.mubr.msk.f32.mxu0 %vm2449_vm2, %v2448_v0  ;;  %2326 = vmatprep.subr.mxu1 %v2448_v0  ;;  %v1949_v19 = vmul.f32 %v1948_v17, %v1035_v7  ;;  %v509_v43 = vrot.slane %v55_v39, %v2643_v38  ;;  %v2205_v50 = vadd.f32 -1.0, %v55_v39  ;;  %v972_v60 = vmul.f32 2.0, %v55_v39 }
   0xa   :  { %2319 = vmatmul.mubr.msk.f32.vlgmr.msra.gmra.mrb[2].mxu1 %vm56_vm1, %v2183_v4  ;;  %2442 = vset.pattern.permute.xlu0 %v2450_v5  ;;  %v969_v20 = vsub.f32 %v965_v14, %v968_v18  ;;  %v970_v2 = vmul.f32 3.0, %v55_v39 }
   0xb   :  { %2328 = vmatprep.mubr.msk.f32.mxu1 %vm2449_vm2, %v2448_v0  ;;  %2443 = vset.pattern.permute.xlu1 %v2450_v5  ;;  %v1950_v21 = vsub.f32 %v1946_v16, %v1949_v19  ;;  %v817_v59 = vrot.slane %v2205_v50, %v2643_v38 }
   0xc   :  { %428 = vperm.xlu0 %2442, %v54_v6   ;;  %1409 = vperm.xlu1 %2443, %v1035_v7   ;;  %v971_v14 = vmul.f32 %v970_v2, %v55_v39 }
  0x10   :  { %589 = vperm.xlu0 %2442, %v2198_v8   ;;  %1570 = vperm.xlu1 %2443, %v2228_v11   ;;  %v973_v8 = vmul.f32 %v972_v60, %v55_v39  ;;  %v1029_v11 = vld [vmem:[%s2736_s7] sm:$0xff] }
  0x14   :  { %979 = vperm.xlu0 %2442, %v969_v20   ;;  %1960 = vperm.xlu1 %2443, %v1950_v21   ;;  %v974_v20 = vmul.f32 %v973_v8, %v55_v39 }
  0x8b   :  { %v429_v40 = vpop.permute.xlu0 %428 }
  0x8f   :  { %v590_v51 = vpop.permute.xlu0 %589 }
  0x93   :  { %v980_v62 = vpop.permute.xlu0 %979 }
  0xd6   :  { %v130_v23 = vpop.f32.mrb[0].mxu0 }
  0xd7   :  { %v2305_v24 = vpop.f32.mrb[1].mxu0  ;;  %2322 = vmatpush3.msk.msra.mxu0 %vm60_vm0, %v130_v23 }
  0xd8   :  { %2324 = vmatmul.mubr.msk.f32.vlgmr.msra.gmra.mrb[4].mxu0 %vm56_vm1, %v48_v22  ;;  %2331 = vmatprep.subr.mxu0 %v2448_v0 }
  0xd9   :  { %2332 = vmatpush3.msk.msra.mxu0 %vm60_vm0, %v130_v23  ;;  %2333 = vmatprep.mubr.msk.f32.mxu0 %vm2449_vm2, %v2448_v0  ;;  %v203_v26 = vpop.f32.mrb[0].mxu1 }
  0xda   :  { %v276_v27 = vpop.f32.mrb[2].mxu0  ;;  %2341 = vmatprep.subr.mxu0 %v2448_v0  ;;  %v2310_v28 = vpop.f32.mrb[1].mxu1 }
  0xdb   :  { %2327 = vmatpush3.msk.msra.mxu1 %vm60_vm0, %v276_v27  ;;  %v2315_v29 = vpop.f32.mrb[3].mxu0  ;;  %v975_v28 = vsub.f32 %v971_v14, %v974_v20 }
  0xdc   :  { %2329 = vmatmul.mubr.msk.f32.vlgmr.msra.gmra.mrb[4].mxu1 %vm56_vm1, %v48_v22  ;;  %2334 = vmatmul.mubr.msk.f32.vlgmr.msra.gmra.mrb[6].mxu0 %vm56_vm1, %v2184_v25 }
  0xdd   :  { %2336 = vmatprep.subr.mxu1 %v2448_v0  ;;  %2342 = vmatpush3.msk.msra.mxu0 %vm60_vm0, %v203_v26  ;;  %v346_v30 = vpop.f32.mrb[2].mxu1 }
  0xde   :  { %2337 = vmatpush3.msk.msra.mxu1 %vm60_vm0, %v276_v27  ;;  %2338 = vmatprep.mubr.msk.f32.mxu1 %vm2449_vm2, %v2448_v0  ;;  %v2320_v31 = vpop.f32.mrb[3].mxu1 }
  0xdf   :  { %2343 = vmatprep.mubr.msk.f32.mxu0 %vm2449_vm2, %v2448_v0  ;;  %2351 = vmatprep.subr.mxu0 %v2448_v0 }
  0xe0   :  { %2339 = vmatmul.mubr.msk.f32.vlgmr.msra.gmra.mrb[6].mxu1 %vm56_vm1, %v2184_v25  ;;  %2344 = vmatmul.mubr.msk.f32.vlgmr.msra.gmra.mrb[8].mxu0 %vm56_vm1, %v48_v22 }
  0xe1   :  { %2352 = vmatpush3.msk.msra.mxu0 %vm60_vm0, %v203_v26  ;;  %2346 = vmatprep.subr.mxu1 %v2448_v0 }
  0xe2   :  { %2347 = vmatpush3.msk.msra.mxu1 %vm60_vm0, %v346_v30  ;;  %2348 = vmatprep.mubr.msk.f32.mxu1 %vm2449_vm2, %v2448_v0 }
  0xe3   :  { %2353 = vmatprep.mubr.msk.f32.mxu0 %vm2449_vm2, %v2448_v0  ;;  %2356 = vmatprep.subr.mxu1 %v2448_v0 }
  0xe4   :  { %2349 = vmatmul.mubr.msk.f32.vlgmr.msra.gmra.mrb[8].mxu1 %vm56_vm1, %v48_v22  ;;  %2354 = vmatmul.mubr.msk.f32.vlgmr.msra.gmra.mrb[10].mxu0 %vm56_vm1, %v2184_v25  ;;  %v2214_v22 = vld [vmem:[%s2736_s7 + $0x8] sm:$0xff] }
  0xe5   :  { %2361 = vmatprep.subr.mxu0 %v2448_v0  ;;  %2357 = vmatpush3.msk.msra.mxu1 %vm60_vm0, %v346_v30 }
  0xe6   :  { %2358 = vmatprep.mubr.msk.f32.mxu1 %vm2449_vm2, %v2448_v0  ;;  %2362 = vmatpush3.msk.msra.mxu0 %vm1041_vm3, %v1032_v32 }
  0xe7   :  { %2363 = vmatprep.mubr.msk.f32.mxu0 %vm2449_vm2, %v2448_v0  ;;  %2371 = vmatprep.subr.mxu0 %v2448_v0 }
  0xe8   :  { %2359 = vmatmul.mubr.msk.f32.vlgmr.msra.gmra.mrb[10].mxu1 %vm56_vm1, %v2184_v25  ;;  %2364 = vmatmul.mubr.msk.f32.vlgmr.msra.gmra.mrb[12].mxu0 %vm1037_vm4, %v1026_v33 }
  0xe9   :  { %2372 = vmatpush3.msk.msra.mxu0 %vm1041_vm3, %v1032_v32  ;;  %2373 = vmatprep.mubr.msk.f32.mxu0 %vm2449_vm2, %v2448_v0 }
  0xea   :  { %2366 = vmatprep.subr.mxu1 %v2448_v0  ;;  %2368 = vmatprep.mubr.msk.f32.mxu1 %vm2449_vm2, %v2448_v0 }
  0xeb   :  { %2367 = vmatpush3.msk.msra.mxu1 %vm1041_vm3, %v2215_v34  ;;  %2381 = vmatprep.subr.mxu0 %v2448_v0 }
  0xec   :  { %2374 = vmatmul.mubr.msk.f32.vlgmr.msra.gmra.mrb[14].mxu0 %vm1037_vm4, %v2213_v35  ;;  %2369 = vmatmul.mubr.msk.f32.vlgmr.msra.gmra.mrb[12].mxu1 %vm1037_vm4, %v1026_v33  ;;  %v992_v33 = vrot.slane %v975_v28, %v2643_v38 }
  0xed   :  { %2376 = vmatprep.subr.mxu1 %v2448_v0  ;;  %2378 = vmatprep.mubr.msk.f32.mxu1 %vm2449_vm2, %v2448_v0 }
  0xee   :  { %2377 = vmatpush3.msk.msra.mxu1 %vm1041_vm3, %v2215_v34  ;;  %2383 = vmatprep.mubr.msk.f32.mxu0 %vm2449_vm2, %v2448_v0 }
  0xef   :  { %2386 = vmatprep.subr.mxu1 %v2448_v0 }
  0xf0   :  { %2379 = vmatmul.mubr.msk.f32.vlgmr.msra.gmra.mrb[14].mxu1 %vm1037_vm4, %v2213_v35 }
  0xf1   :  { %2388 = vmatprep.mubr.msk.f32.mxu1 %vm2449_vm2, %v2448_v0 }
 0x1ab   :  { %v422_v41 = vpop.f32.mrb[4].mxu0 }
 0x1ac   :  { %v2325_v42 = vpop.f32.mrb[5].mxu0  ;;  %v431_v46 = vmul.f32 %v429_v40, %v422_v41 }
 0x1af   :  { %v501_v44 = vpop.f32.mrb[4].mxu1  ;;  %v583_v45 = vpop.f32.mrb[6].mxu0 }
 0x1b0   :  { %v511_v47 = vmul.f32 %v509_v43, %v501_v44  ;;  %v2335_v48 = vpop.f32.mrb[7].mxu0  ;;  %v2330_v49 = vpop.f32.mrb[5].mxu1  ;;  %v592_v55 = vmul.f32 %v590_v51, %v583_v45 }
 0x1b2   :  { %v512_v52 = vadd.f32 %v511_v47, %v431_v46 }
 0x1b3   :  { %v659_v53 = vpop.f32.mrb[6].mxu1  ;;  %v734_v54 = vpop.f32.mrb[8].mxu0 }
 0x1b4   :  { %v663_v56 = vmul.f32 %v659_v53, %v509_v43  ;;  %v2345_v57 = vpop.f32.mrb[9].mxu0  ;;  %v2340_v58 = vpop.f32.mrb[7].mxu1  ;;  %v738_v3 = vmul.f32 %v734_v54, %v429_v40 }
 0x1b5   :  { %v1410_v40 = vpop.permute.xlu1 %1409 }
 0x1b6   :  { %v664_v61 = vadd.f32 %v663_v56, %v592_v55  ;;  %v1036_v56 = vld [vmem:[%s2737_s10] sm:$0x1] }
 0x1b7   :  { %v809_v63 = vpop.f32.mrb[8].mxu1  ;;  %v887_v1 = vpop.f32.mrb[10].mxu0 }
 0x1b8   :  { %v819_v4 = vmul.f32 %v817_v59, %v809_v63  ;;  %v2355_v5 = vpop.f32.mrb[11].mxu0  ;;  %v976_v6 = vsub.f32 %v664_v61, %v512_v52  ;;  %v2350_v7 = vpop.f32.mrb[9].mxu1  ;;  %v891_v15 = vmul.f32 %v887_v1, %v590_v51 }
 0x1b9   :  { %v1571_v41 = vpop.permute.xlu1 %1570 }
 0x1ba   :  { %v820_v9 = vadd.f32 %v819_v4, %v738_v3  ;;  %v982_v10 = vmul.f32 %v980_v62, %v976_v6  ;;  %v2235_v3 = vadd.f32 -1.0, %v1036_v56 }
 0x1bb   :  { %v958_v12 = vpop.f32.mrb[10].mxu1  ;;  %v1111_v13 = vpop.f32.mrb[12].mxu0 }
 0x1bc   :  { %v983_v16 = vadd.f32 %v982_v10, %v512_v52  ;;  %v962_v17 = vmul.f32 %v958_v12, %v817_v59  ;;  %v2365_v18 = vpop.f32.mrb[13].mxu0  ;;  %2382 = vmatpush3.msk.msra.mxu0 %vm1041_vm3, %v1111_v13  ;;  %v2360_v19 = vpop.f32.mrb[11].mxu1  ;;  %v1490_v59 = vrot.slane %v1036_v56, %v2643_v38  ;;  %v1953_v12 = vmul.f32 2.0, %v1036_v56 }
 0x1bd   :  { %2384 = vmatmul.mubr.msk.f32.vlgmr.msra.gmra.mrb[16].mxu0 %vm1037_vm4, %v1029_v11  ;;  %2391 = vmatprep.subr.mxu0 %v2448_v0  ;;  %v1961_v42 = vpop.permute.xlu1 %1960 }
 0x1be   :  { %v963_v21 = vadd.f32 %v962_v17, %v891_v15  ;;  %2392 = vmatpush3.msk.msra.mxu0 %vm1041_vm3, %v1111_v13  ;;  %2393 = vmatprep.mubr.msk.f32.mxu0 %vm2449_vm2, %v2448_v0 }
 0x1bf   :  { %v1257_v23 = vpop.f32.mrb[14].mxu0  ;;  %v1184_v24 = vpop.f32.mrb[12].mxu1  ;;  %2401 = vmatprep.subr.mxu0 %v2448_v0 }
 0x1c0   :  { %v984_v25 = vsub.f32 %v963_v21, %v820_v9  ;;  %v2375_v26 = vpop.f32.mrb[15].mxu0  ;;  %2387 = vmatpush3.msk.msra.mxu1 %vm1041_vm3, %v1257_v23  ;;  %v2370_v27 = vpop.f32.mrb[13].mxu1  ;;  %v1951_v21 = vmul.f32 3.0, %v1036_v56 }
 0x1c1   :  { %2389 = vmatmul.mubr.msk.f32.vlgmr.msra.gmra.mrb[16].mxu1 %vm1037_vm4, %v1029_v11  ;;  %2394 = vmatmul.mubr.msk.f32.vlgmr.msra.gmra.mrb[18].mxu0 %vm1037_vm4, %v2214_v22 }
 0x1c2   :  { %v985_v29 = vmul.f32 %v984_v25, %v980_v62  ;;  %2396 = vmatprep.subr.mxu1 %v2448_v0  ;;  %2402 = vmatpush3.msk.msra.mxu0 %vm1041_vm3, %v1184_v24 }
 0x1c3   :  { %2397 = vmatpush3.msk.msra.mxu1 %vm1041_vm3, %v1257_v23  ;;  %2398 = vmatprep.mubr.msk.f32.mxu1 %vm2449_vm2, %v2448_v0  ;;  %v1327_v30 = vpop.f32.mrb[14].mxu1 }
 0x1c4   :  { %v986_v31 = vadd.f32 %v985_v29, %v820_v9  ;;  %2403 = vmatprep.mubr.msk.f32.mxu0 %vm2449_vm2, %v2448_v0  ;;  %2411 = vmatprep.subr.mxu0 %v2448_v0  ;;  %v2380_v32 = vpop.f32.mrb[15].mxu1 }
 0x1c5   :  { %2399 = vmatmul.mubr.msk.f32.vlgmr.msra.gmra.mrb[18].mxu1 %vm1037_vm4, %v2214_v22  ;;  %2404 = vmatmul.mubr.msk.f32.vlgmr.msra.gmra.mrb[20].mxu0 %vm1037_vm4, %v1029_v11 }
 0x1c6   :  { %2412 = vmatpush3.msk.msra.mxu0 %vm1041_vm3, %v1184_v24  ;;  %2406 = vmatprep.subr.mxu1 %v2448_v0  ;;  %v987_v34 = vsub.f32 %v986_v31, %v983_v16 }
 0x1c7   :  { %2407 = vmatpush3.msk.msra.mxu1 %vm1041_vm3, %v1327_v30  ;;  %2408 = vmatprep.mubr.msk.f32.mxu1 %vm2449_vm2, %v2448_v0 }
 0x1c8   :  { %2413 = vmatprep.mubr.msk.f32.mxu0 %vm2449_vm2, %v2448_v0  ;;  %2416 = vmatprep.subr.mxu1 %v2448_v0  ;;  %v994_v35 = vmul.f32 %v992_v33, %v987_v34 }
 0x1c9   :  { %2409 = vmatmul.mubr.msk.f32.vlgmr.msra.gmra.mrb[20].mxu1 %vm1037_vm4, %v1029_v11  ;;  %2414 = vmatmul.mubr.msk.f32.vlgmr.msra.gmra.mrb[22].mxu0 %vm1037_vm4, %v2214_v22  ;;  %v1798_v11 = vrot.slane %v2235_v3, %v2643_v38 }
 0x1ca   :  { %2417 = vmatpush3.msk.msra.mxu1 %vm1041_vm3, %v1327_v30  ;;  %2418 = vmatprep.mubr.msk.f32.mxu1 %vm2449_vm2, %v2448_v0  ;;  %v2690_v36 = vadd.f32 %v994_v35, %v983_v16  ;;  %v1952_v30 = vmul.f32 %v1951_v21, %v1036_v56 }
 0x1cc   :  { %v1008_v37 = vsel %vm996_vm5, %v2690_v36, -inf  ;;  %v997_v39 = vsel %vm996_vm5, %v2690_v36, inf }
 0x1cd   :  { %1009 = vmax.xlane.f32.xlu1 %v1008_v37  ;;  %998 = vmin.xlane.f32.xlu0 %v997_v39 }
 0x1ce   :  { %2419 = vmatmul.mubr.msk.f32.vlgmr.msra.gmra.mrb[22].mxu1 %vm1037_vm4, %v2214_v22  ;;  %v1954_v22 = vmul.f32 %v1953_v12, %v1036_v56 }
 0x1d0   :  { %v1955_v31 = vmul.f32 %v1954_v22, %v1036_v56 }
 0x1d2   :  { %v1956_v34 = vsub.f32 %v1952_v30, %v1955_v31 }
 0x1d4   :  { %v1973_v39 = vrot.slane %v1956_v34, %v2643_v38 }
 0x25a   :  { %v1010_v43 = vpop.xlane.xlu1 %1009  ;;  %v999_v44 = vpop.xlane.xlu0 %998 }
 0x25b   :  { %v1011_v45 = vrot.slane %v1010_v43, 4  ;;  %v1000_v46 = vrot.slane %v999_v44, 4 }
 0x25d   :  { %v1012_v0 = vmax.f32 %v1010_v43, %v1011_v45  ;;  %v1001_v47 = vmin.f32 %v999_v44, %v1000_v46 }
 0x25f   :  { %v1013_v48 = vrot.slane %v1012_v0, 2  ;;  %v1002_v49 = vrot.slane %v1001_v47, 2 }
 0x261   :  { %v1014_v50 = vmax.f32 %v1012_v0, %v1013_v48  ;;  %v1003_v51 = vmin.f32 %v1001_v47, %v1002_v49 }
 0x263   :  { %v1004_v52 = vrot.slane %v1003_v51, 1  ;;  %v1015_v53 = vrot.slane %v1014_v50, 1 }
 0x265   :  { %v1005_v54 = vmin.f32 %v1003_v51, %v1004_v52  ;;  %v1016_v55 = vmax.f32 %v1014_v50, %v1015_v53 }
 0x267   :  { %2431 = vpush %v1005_v54 }
 0x268   :  { %2433 = vpush %v1016_v55 }
 0x290   :  { %v1403_v57 = vpop.f32.mrb[16].mxu0 }
 0x291   :  { %v2385_v58 = vpop.f32.mrb[17].mxu0  ;;  %v1412_v60 = vmul.f32 %v1410_v40, %v1403_v57 }
 0x294   :  { %v1482_v61 = vpop.f32.mrb[16].mxu1  ;;  %v1564_v62 = vpop.f32.mrb[18].mxu0 }
 0x295   :  { %v1492_v63 = vmul.f32 %v1490_v59, %v1482_v61  ;;  %v2390_v1 = vpop.f32.mrb[17].mxu1  ;;  %v2395_v2 = vpop.f32.mrb[19].mxu0  ;;  %v1573_v5 = vmul.f32 %v1571_v41, %v1564_v62 }
 0x297   :  { %v1493_v4 = vadd.f32 %v1492_v63, %v1412_v60 }
 0x298   :  { %v1640_v6 = vpop.f32.mrb[18].mxu1  ;;  %v1715_v7 = vpop.f32.mrb[20].mxu0  ;;  %s2432_s15 = spop %2431 }
 0x299   :  { %v1644_v8 = vmul.f32 %v1640_v6, %v1490_v59  ;;  %v2400_v9 = vpop.f32.mrb[19].mxu1  ;;  %v2405_v10 = vpop.f32.mrb[21].mxu0  ;;  %v1719_v14 = vmul.f32 %v1715_v7, %v1410_v40  ;;  %s2434_s1 = spop %2433  ;;  %v1007_v58 = vstv %s2432_s15 }
 0x29a   :  { %v1018_v59 = vstv %s2434_s1  ;;  %v1019_v2 = vsub.f32 %v2690_v36, %v1007_v58  ;;  %v2090_v36 = vld [vmem:[%s2739_s12] sm:$0xff] }
 0x29b   :  { %v1645_v13 = vadd.f32 %v1644_v8, %v1573_v5  ;;  %v1020_v60 = vsub.f32 %v1018_v59, %v1007_v58  ;;  %2426 = vmatprep.subr.mxu1 %v2090_v36 }
 0x29c   :  { %v1790_v15 = vpop.f32.mrb[20].mxu1  ;;  %v1868_v16 = vpop.f32.mrb[22].mxu0  ;;  %2427 = vmatpush3.msra.mxu1 %v2090_v36 }
 0x29d   :  { %v1957_v17 = vsub.f32 %v1645_v13, %v1493_v4  ;;  %v1800_v18 = vmul.f32 %v1798_v11, %v1790_v15  ;;  %v2410_v19 = vpop.f32.mrb[21].mxu1  ;;  %v2415_v20 = vpop.f32.mrb[23].mxu0  ;;  %v1872_v27 = vmul.f32 %v1868_v16, %v1571_v41  ;;  %v2007_v41 = vld [vmem:[%s2738_s11] sm:$0xff]  ;;  %2444 = vrcp.f32 %v1020_v60 }
 0x29e   :  { %2423 = vmatprep.mubr.msk.f32.mxu0 %vm996_vm5, %v2007_v41 }
 0x29f   :  { %v1963_v23 = vmul.f32 %v1961_v42, %v1957_v17  ;;  %v1801_v24 = vadd.f32 %v1800_v18, %v1719_v14  ;;  %v2008_v14 = vld [vmem:[%s2738_s11 + $0x8] sm:$0xff]  ;;  %v2173_v17 = vstv %s2740_s0 }
 0x2a1   :  { %v1939_v25 = vpop.f32.mrb[22].mxu1  ;;  %v1964_v26 = vadd.f32 %v1963_v23, %v1493_v4 }
 0x2a2   :  { %v1943_v28 = vmul.f32 %v1939_v25, %v1798_v11  ;;  %v2420_v29 = vpop.f32.mrb[23].mxu1 }
 0x2a4   :  { %v1944_v32 = vadd.f32 %v1943_v28, %v1872_v27 }
 0x2a6   :  { %v1965_v33 = vsub.f32 %v1944_v32, %v1801_v24 }
 0x2a7   :  { %v2445_v1 = vpop.eup %2444 }
 0x2a8   :  { %v1966_v35 = vmul.f32 %v1965_v33, %v1961_v42  ;;  %v1022_v3 = vmul.f32 %v2445_v1, %v1019_v2 }
 0x2aa   :  { %v1967_v37 = vadd.f32 %v1966_v35, %v1801_v24  ;;  %v1023_v5 = vmul.f32 2.0, %v1022_v3 }
 0x2ac   :  { %v1968_v40 = vsub.f32 %v1967_v37, %v1964_v26  ;;  %v2212_v8 = vadd.f32 -1.0, %v1023_v5 }
 0x2ae   :  { %v1975_v43 = vmul.f32 %v1973_v39, %v1968_v40  ;;  %v1025_v11 = vmul.f32 0.1, %v2212_v8 }
 0x2b0   :  { %v1976_v44 = vadd.f32 %v1975_v43, %v1964_v26 }
 0x2b2   :  { %v1977_v45 = vsel %vm996_vm5, %v1976_v44, inf  ;;  %v1988_v46 = vsel %vm996_vm5, %v1976_v44, -inf }
 0x2b3   :  { %1978 = vmin.xlane.f32.xlu0 %v1977_v45 }
 0x2b7   :  { %1989 = vmax.xlane.f32.xlu0 %v1988_v46 }
 0x340   :  { %v1979_v0 = vpop.xlane.xlu0 %1978 }
 0x341   :  { %v1980_v42 = vrot.slane %v1979_v0, 4 }
 0x343   :  { %v1981_v47 = vmin.f32 %v1979_v0, %v1980_v42 }
 0x344   :  { %v1990_v48 = vpop.xlane.xlu0 %1989 }
 0x345   :  { %v1982_v38 = vrot.slane %v1981_v47, 2  ;;  %v1991_v49 = vrot.slane %v1990_v48, 4 }
 0x347   :  { %v1992_v50 = vmax.f32 %v1990_v48, %v1991_v49  ;;  %v1983_v51 = vmin.f32 %v1981_v47, %v1982_v38 }
 0x349   :  { %v1993_v52 = vrot.slane %v1992_v50, 2  ;;  %v1984_v53 = vrot.slane %v1983_v51, 1 }
 0x34b   :  { %v1994_v54 = vmax.f32 %v1992_v50, %v1993_v52  ;;  %v1985_v55 = vmin.f32 %v1983_v51, %v1984_v53 }
 0x34d   :  { %2435 = vpush %v1985_v55  ;;  %v1995_v56 = vrot.slane %v1994_v54, 1 }
 0x34f   :  { %v1996_v57 = vmax.f32 %v1994_v54, %v1995_v56 }
 0x351   :  { %2437 = vpush %v1996_v57 }
 0x37e   :  { %s2436_s3 = spop %2435 }
 0x37f   :  { %v1987_v61 = vstv %s2436_s3 }
 0x380   :  { %v1999_v4 = vsub.f32 %v1976_v44, %v1987_v61 }
 0x382   :  { %s2438_s16 = spop %2437 }
 0x383   :  { %v1998_v62 = vstv %s2438_s16 }
 0x384   :  { %v2000_v63 = vsub.f32 %v1998_v62, %v1987_v61 }
 0x386   :  { %2446 = vrcp.f32 %v2000_v63 }
 0x390   :  { %v2447_v6 = vpop.eup %2446 }
 0x391   :  { %v2002_v7 = vmul.f32 %v2447_v6, %v1999_v4 }
 0x393   :  { %v2003_v9 = vmul.f32 2.0, %v2002_v7 }
 0x395   :  { %v2242_v10 = vadd.f32 -1.0, %v2003_v9 }
 0x397   :  { %v2005_v12 = vmul.f32 0.05, %v2242_v10 }
 0x399   :  { %v2006_v13 = vadd.f32 %v2005_v12, %v1025_v11 }
 0x39b   :  { %2421 = vmatprep.subr.mxu0 %v2006_v13 }
 0x39c   :  { %2422 = vmatpush3.msra.mxu0 %v2006_v13 }
 0x39d   :  { %2424 = vmatmul.mubr.msk.f32.vlgmr.msra.gmra.mrb[24].mxu0 %vm996_vm5, %v2008_v14 }
 0x470   :  { %v2425_v15 = vpop.f32.mrb[24].mxu0 }
 0x471   :  { %v2081_v16 = vpop.f32.mrb[25].mxu0 }
 0x472   :  { %2428 = vmatprep.mubr.msk.f32.mxu1 %vm996_vm5, %v2081_v16 }
 0x473   :  { %2429 = vmatmul.mubr.msk.f32.vlgmr.msra.gmra.mrb[24].mxu1 %vm996_vm5, %v2425_v15 }
 0x546   :  { %v2430_v18 = vpop.f32.mrb[24].mxu1 }
 0x547   :  { %v2175_v19 = vmul.f32 %v2430_v18, %v2173_v17  ;;  %v2163_v20 = vpop.f32.mrb[25].mxu1 }
 0x548   :  { %v2174_v21 = vmul.f32 %v2173_v17, %v2163_v20 }
 0x549   :  { %2178 = vst.msk [vmem:[%s2741_s13 + $0x8] sm:$0xff] %vm2176_vm6, %v2175_v19 }
 0x54a   :  { %2177 = vst.msk [vmem:[%s2741_s13] sm:$0xff] %vm2176_vm6, %v2174_v21 }

</bundles_post_ra>
